<compile_context>
chip_gen: v7x
topology: tpu7x:2x2x1
jax: 0.10.0
libtpu: 0.0.40
codegen_flags: <defaults>
</compile_context>

<pallas_src>
import functools
import math

import jax
import jax.numpy as jnp
from jax.experimental import pallas as pl
from jax.experimental.pallas import tpu as pltpu


# --------------------------------------------------------------------------- #
# roll-convention probe: pltpu.roll is documented to match jnp.roll, but the
# kernel's correctness depends on the sign convention, so determine it once on
# the device with a trivial kernel and bake the right static shift amounts in.
# --------------------------------------------------------------------------- #
def _roll_probe_kernel(x_ref, o_ref):
    o_ref[...] = pltpu.roll(x_ref[...], 1, axis=1)


@functools.lru_cache(maxsize=None)
def _roll_matches_jnp() -> bool:
    x = jnp.arange(8 * 128, dtype=jnp.float32).reshape(8, 128)
    y = pl.pallas_call(
        _roll_probe_kernel,
        out_shape=jax.ShapeDtypeStruct((8, 128), jnp.float32),
    )(x)
    fwd = bool(jnp.array_equal(y, jnp.roll(x, 1, axis=1)))
    bwd = bool(jnp.array_equal(y, jnp.roll(x, -1, axis=1)))
    assert fwd or bwd, "unexpected pltpu.roll semantics"
    return fwd


# --------------------------------------------------------------------------- #
# Fused DoubleConv Pallas kernel (one batch element per grid step).
# Layout inside the kernel: activations are (C, H*W) with H*W on lanes.
# --------------------------------------------------------------------------- #
def _doubleconv_kernel(x_ref, w1_ref, w2_ref, b_ref, o_ref, *,
                       H, W, c_out, roll_like_jnp):
    HW = H * W

    # Per-lane spatial coordinates (built once, reused by both stages).
    lane = jax.lax.broadcasted_iota(jnp.int32, (1, HW), 1)
    yy = lane // W
    xx = lane - yy * W
    row_ok = (yy >= 1, None, yy <= H - 2)        # dy = 0, 1, 2
    col_ok = (xx >= 1, None, xx <= W - 2)        # dx = 0, 1, 2

    def conv3x3_bias_relu(xin, w_taps, bias):
        # xin: (c_in, HW); w_taps: (9*c_out, c_in); bias: (c_out, 1)
        # One MXU matmul produces all 9 per-tap partial outputs at once.
        taps = jnp.dot(w_taps, xin, preferred_element_type=jnp.float32)
        acc = jnp.zeros((c_out, HW), jnp.float32)
        for dy in range(3):
            for dx in range(3):
                k = dy * 3 + dx
                t = taps[k * c_out:(k + 1) * c_out, :]       # (c_out, HW)
                s = (dy - 1) * W + (dx - 1)                  # flat tap offset
                if s != 0:
                    # want t'[p] = t[p + s]  (wrapped values are masked below)
                    amt = (-s) % HW if roll_like_jnp else s % HW
                    t = pltpu.roll(t, amt, axis=1)
                m = row_ok[dy]
                if col_ok[dx] is not None:
                    m = col_ok[dx] if m is None else jnp.logical_and(m, col_ok[dx])
                if m is not None:
                    t = jnp.where(m, t, 0.0)
                acc = acc + t
        return jnp.maximum(acc + bias, 0.0)

    x1 = conv3x3_bias_relu(x_ref[0], w1_ref[...], b_ref[0])   # stage 1
    x2 = conv3x3_bias_relu(x1, w2_ref[...], b_ref[1])         # stage 2 (grouped)
    o_ref[0] = x2.astype(o_ref.dtype)


# --------------------------------------------------------------------------- #
# Host-side parameter preparation.
# --------------------------------------------------------------------------- #
def _stack_taps(w_oihw):
    """(O, I, 3, 3) -> (9*O, I), row index = (dy*3+dx)*O + o."""
    O, I, KH, KW = w_oihw.shape
    return jnp.transpose(w_oihw, (2, 3, 0, 1)).reshape(KH * KW * O, I)


def _expand_grouped(w, groups):
    """(O, I/g, 3, 3) grouped weight -> dense block-diagonal (O, I, 3, 3)."""
    O, Ig, KH, KW = w.shape
    og = O // groups
    dense = jnp.zeros((O, Ig * groups, KH, KW), w.dtype)
    for g in range(groups):
        dense = dense.at[g * og:(g + 1) * og, g * Ig:(g + 1) * Ig].set(
            w[g * og:(g + 1) * og])
    return dense


def _fold_params(p, eps=1e-5):
    """Fold eval-mode BN (+ conv bias) into conv weights and a per-channel bias."""
    s1 = p["g1"] / jnp.sqrt(p["v1"] + eps)
    b1 = p["be1"] + s1 * (p["bc1"] - p["m1"])
    s2 = p["g2"] / jnp.sqrt(p["v2"] + eps)
    b2 = p["be2"] + s2 * (p["bc2"] - p["m2"])
    w1 = p["w1"] * s1[:, None, None, None]
    w2 = _expand_grouped(p["w2"], p["groups"]) * s2[:, None, None, None]
    w1s = _stack_taps(w1)                              # (9*out, in)
    w2s = _stack_taps(w2)                              # (9*out, out)
    bias = jnp.stack([b1, b2], axis=0)[:, :, None]     # (2, out, 1)
    return w1s, w2s, bias


def doubleconv(x_nchw, params):
    """DoubleConv forward.  Input/output are NCHW (PyTorch convention)."""
    N, Cin, H, W = x_nchw.shape
    HW = H * W
    w1s, w2s, bias = _fold_params(params)
    Cout = w1s.shape[0] // 9
    assert HW % 128 == 0, "kernel keeps H*W on the lane dim (needs H*W % 128 == 0)"
    assert Cout % 8 == 0, "output channels must be a multiple of 8 (sublane dim)"

    kernel = functools.partial(_doubleconv_kernel, H=H, W=W, c_out=Cout,
                               roll_like_jnp=_roll_matches_jnp())
    y = pl.pallas_call(
        kernel,
        out_shape=jax.ShapeDtypeStruct((N, Cout, HW), jnp.float32),
        grid=(N,),
        in_specs=[
            pl.BlockSpec((1, Cin, HW), lambda b: (b, 0, 0)),
            pl.BlockSpec((9 * Cout, Cin), lambda b: (0, 0)),
            pl.BlockSpec((9 * Cout, Cout), lambda b: (0, 0)),
            pl.BlockSpec((2, Cout, 1), lambda b: (0, 0, 0)),
        ],
        out_specs=pl.BlockSpec((1, Cout, HW), lambda b: (b, 0, 0)),
        compiler_params=pltpu.CompilerParams(dimension_semantics=("parallel",)),
    )(x_nchw.reshape(N, Cin, HW), w1s, w2s, bias)
    return y.reshape(N, Cout, H, W)


# --------------------------------------------------------------------------- #
# Deterministic parameters (PyTorch layout) and a pure-JAX reference.
# --------------------------------------------------------------------------- #
def make_params(key, in_ch, out_ch, groups=4):
    assert out_ch % groups == 0 and out_ch % groups == 0
    ks = jax.random.split(key, 12)
    w1 = jax.random.normal(ks[0], (out_ch, in_ch, 3, 3), jnp.float32) / math.sqrt(in_ch * 9)
    bc1 = 0.1 * jax.random.normal(ks[1], (out_ch,), jnp.float32)
    g1 = jax.random.uniform(ks[2], (out_ch,), jnp.float32, 0.5, 1.5)
    be1 = 0.1 * jax.random.normal(ks[3], (out_ch,), jnp.float32)
    m1 = 0.1 * jax.random.normal(ks[4], (out_ch,), jnp.float32)
    v1 = jax.random.uniform(ks[5], (out_ch,), jnp.float32, 0.5, 1.5)
    ig = out_ch // groups
    w2 = jax.random.normal(ks[6], (out_ch, ig, 3, 3), jnp.float32) / math.sqrt(ig * 9)
    bc2 = 0.1 * jax.random.normal(ks[7], (out_ch,), jnp.float32)
    g2 = jax.random.uniform(ks[8], (out_ch,), jnp.float32, 0.5, 1.5)
    be2 = 0.1 * jax.random.normal(ks[9], (out_ch,), jnp.float32)
    m2 = 0.1 * jax.random.normal(ks[10], (out_ch,), jnp.float32)
    v2 = jax.random.uniform(ks[11], (out_ch,), jnp.float32, 0.5, 1.5)
    return dict(w1=w1, bc1=bc1, g1=g1, be1=be1, m1=m1, v1=v1,
                w2=w2, bc2=bc2, g2=g2, be2=be2, m2=m2, v2=v2, groups=groups)


def _conv3x3_ref(x, w, bias, groups):
    """PyTorch Conv2d(k=3, pad=1, stride=1, groups) semantics, NCHW."""
    N, Cin, H, W = x.shape
    Cout = w.shape[0]
    og, ig = Cout // groups, Cin // groups
    xp = jnp.pad(x, ((0, 0), (0, 0), (1, 1), (1, 1)))
    outs = []
    for g in range(groups):
        xg = xp[:, g * ig:(g + 1) * ig]
        wg = w[g * og:(g + 1) * og]
        acc = jnp.zeros((N, og, H, W), jnp.float32)
        for dy in range(3):
            for dx in range(3):
                acc = acc + jnp.einsum("nchw,oc->nohw",
                                       xg[:, :, dy:dy + H, dx:dx + W],
                                       wg[:, :, dy, dx])
        outs.append(acc)
    return jnp.concatenate(outs, axis=1) + bias[None, :, None, None]


def doubleconv_ref(x, p, eps=1e-5):
    def bn_relu(z, g, be, m, v):
        zz = (z - m[None, :, None, None]) / jnp.sqrt(v[None, :, None, None] + eps)
        return jnp.maximum(zz * g[None, :, None, None] + be[None, :, None, None], 0.0)

    y = bn_relu(_conv3x3_ref(x, p["w1"], p["bc1"], 1),
                p["g1"], p["be1"], p["m1"], p["v1"])
    z = bn_relu(_conv3x3_ref(y, p["w2"], p["bc2"], p["groups"]),
                p["g2"], p["be2"], p["m2"], p["v2"])
    return z


# ----------------------------------- main ---------------------------------- #
if __name__ == "__main__":
    key = jax.random.PRNGKey(0)
    kx, kp = jax.random.split(key)

    N, Cin, H, W = 2, 4, 16, 16
    Cout = 8
    x = jax.random.normal(kx, (N, Cin, H, W), jnp.float32)
    p = make_params(kp, Cin, Cout)   # DoubleConv(in_ch=4, out_ch=8), groups=4

    y = doubleconv(x, p)
    jax.block_until_ready(y)

    y_ref = doubleconv_ref(x, p)
    assert y.shape == (N, Cout, H, W), y.shape
    max_err = float(jnp.max(jnp.abs(y - y_ref)))
    assert jnp.allclose(y, y_ref, atol=1e-3, rtol=1e-3), f"mismatch, max_err={max_err}"

    print("KERNEL_OK")
</pallas_src>

<mosaic_0001>
module attributes {stable_mosaic.version = 11 : i64} {
  func.func @_roll_probe_kernel(%arg0: memref<8x128xf32, #tpu.memory_space<vmem>>, %arg1: memref<8x128xf32, #tpu.memory_space<vmem>>) attributes {dimension_semantics = [], scalar_prefetch = 0 : i64, scratch_operands = 0 : i64, tpu.core_type = #tpu.core_type<tc>} {
    %c0 = arith.constant 0 : index
    %c0_0 = arith.constant 0 : index
    %0 = vector.load %arg0[%c0, %c0_0] : memref<8x128xf32, #tpu.memory_space<vmem>>, vector<8x128xf32>
    %c1_i32 = arith.constant 1 : i32
    %1 = tpu.dynamic_rotate %0 by %c1_i32 dim 1 : vector<8x128xf32>, i32 -> vector<8x128xf32>
    %c0_1 = arith.constant 0 : index
    %c0_2 = arith.constant 0 : index
    %2 = vector.load %arg1[%c0_1, %c0_2] : memref<8x128xf32, #tpu.memory_space<vmem>>, vector<8x128xf32>
    tpu.vector_store %arg1[%c0_1, %c0_2], %1 {strides = array<i32>} : memref<8x128xf32, #tpu.memory_space<vmem>>, vector<8x128xf32>,
    return
  }
}

</mosaic_0001>

<bundles_post_ra>
// kernel: tpu_custom_call.1
= control target key start
LH: loop header
LB: loop body
LE: loop exit
PB: predicated region body
PF: predicated region fallthrough
CT: control target
= control target key end

     0   :  { %6 = vsyncpa [#allocation3], 0  ;;  %s128_s0 = inlined_call_operand.hbm [shape: f32[8,128], index: 0, kind: input, shape index: {}]   ;;  %s129_s1 = inlined_call_operand.hbm [shape: f32[8,128], index: 1, kind: output, shape index: {}]  }
   0x1   :  { %7 = vsyncpa [#allocation4], 0  ;;  %s91_s6 = smov [#allocation2]   ;;  %s43_s10 = scalar_lea.hbm %s128_s0, 128 }
   0x2   :  { %s14_s7 = sshll.u32 %s91_s6, 4  ;;  %p44_p0 = scmp.ne.s32.totalorder %s128_s0, %s43_s10  ;;  %s15_s7 = int_to_ptr.vmem [resolvable:$true] %s14_s7 }
   0x3   :  { %p47_p1 = scmp.lt.u32.totalorder %s43_s10, %s128_s0 }
   0x5   :  { %p49_p2 = pnand %p47_p1, %p44_p0 }
   0x7   :  { %52 = shalt.err (!%p49_p2)
}
   0x8   :  { %s53_s15 = scalar_lea.vmem %s15_s7, 128  ;;  %p58_p4 = scmp.lt.s32.totalorder %s15_s7, %s15_s7 }
   0x9   :  { %p54_p3 = scmp.ne.s32.totalorder %s15_s7, %s53_s15  ;;  %p59_p5 = scmp.lt.s32.totalorder %s53_s15, %s53_s15 }
   0xb   :  { %p60_p6 = por %p59_p5, %p58_p4 }
   0xd   :  { %p61_p7 = pnand %p60_p6, %p54_p3 }
   0xf   :  { %64 = shalt.err (!%p61_p7)
}
  0x10   :  { %17 = dma.hbm_to_vmem [thread:$0]  %s128_s0, 128, %s15_s7, [#allocation3]  }
  0x11   :  { %87 = dma.done.wait [#allocation3], 128  }
  0x12   :  { %88 = vsyncadd [#allocation3], 4294967168  ;;  %v21_v0 = vld [vmem:[#allocation2] sm:$0xff]  ;;  %s92_s18 = smov 1   ;;  %s93_s19 = smov [#allocation5]  }
  0x13   :  { %22 = vrot.lane.b32.xlu0 %v21_v0, %s92_s18  ;;  %s31_s20 = sshll.u32 %s93_s19, 4  ;;  %s32_s20 = int_to_ptr.vmem [resolvable:$true] %s31_s20 }
  0x14   :  { %s65_s21 = scalar_lea.vmem %s32_s20, 128  ;;  %p70_p9 = scmp.lt.s32.totalorder %s32_s20, %s32_s20 }
  0x15   :  { %p66_p8 = scmp.ne.s32.totalorder %s32_s20, %s65_s21  ;;  %p71_p10 = scmp.lt.s32.totalorder %s65_s21, %s65_s21 }
  0x17   :  { %p72_p11 = por %p71_p10, %p70_p9 }
  0x19   :  { %p73_p12 = pnand %p72_p11, %p66_p8 }
  0x85   :  { %v23_v1 = vpop.permute.xlu0 %22 }
  0x86   :  { %24 = vst [vmem:[#allocation5] sm:$0xff] %v23_v1 }
  0x87   :  { %76 = shalt.err (!%p73_p12)
}
  0x88   :  { %s77_s0 = scalar_lea.hbm %s129_s1, 128 }
  0x89   :  { %p78_p13 = scmp.ne.s32.totalorder %s129_s1, %s77_s0  ;;  %p81_p0 = scmp.lt.u32.totalorder %s77_s0, %s129_s1 }
  0x8b   :  { %p83_p1 = pnand %p81_p0, %p78_p13 }
  0x8d   :  { %86 = shalt.err (!%p83_p1)
}
  0x8e   :  { %34 = dma.vmem_to_hbm [thread:$0]  %s32_s20, 128, %s129_s1, [#allocation4]  }
  0x8f   :  { %89 = dma.done.wait [#allocation4], 128  }
  0x90   :  { %90 = vsyncadd [#allocation4], 4294967168 }
  0x91   :  { %38 = vsyncpa [#allocation3], 1 }
  0x92   :  { %39 = vsyncpa [#allocation4], 1 }

</bundles_post_ra>
